<compile_context>
chip_gen: v5e
topology: v5e:2x2
jax: 0.10.0
libtpu: 0.0.40
codegen_flags: <defaults>
</compile_context>

<pallas_src>
import functools
import math

import jax
import jax.numpy as jnp
from jax import lax
from jax.experimental import pallas as pl
from jax.experimental.pallas import tpu as pltpu


# ----------------------------------------------------------------------------- 
# Kernel
# -----------------------------------------------------------------------------
def _conv_block_kernel(w_ref, x_ref, b_ref, o_ref):
    """One M-tile (lane axis) per grid step.

    w_ref : (C_out_p, K_p)     flattened weights (resident; same block each step)
    x_ref : (K_p, tile_m)      im2col patches, K_p = pad8(KH*KW*C_in)
    b_ref : (C_out_p, 1)       f32 bias (broadcasts along lanes)
    o_ref : (C_out_p, tile_m)  lane-dense f32 output tile
    """
    acc = jnp.dot(w_ref[...], x_ref[...], preferred_element_type=jnp.float32)
    acc = acc + b_ref[...]
    acc = jnp.maximum(acc, 0.1 * acc)          # LeakyReLU(0.1), f32 epilogue
    o_ref[...] = acc.astype(o_ref.dtype)


# ----------------------------------------------------------------------------- 
# Trace-time helpers (chip-aware tiling / dtype choices)
# -----------------------------------------------------------------------------
def _round_up(v, mult):
    return ((v + mult - 1) // mult) * mult


def _tensorcores_per_chip():
    """v5e/v6e expose 1 TensorCore per device; v7x exposes 2 (megacore)."""
    try:
        kind = jax.devices()[0].device_kind.lower()
    except Exception:
        return 1
    return 2 if "v7" in kind else 1


def _mxu_prefers_bf16():
    """v6e/v7x MXUs are bf16-native; keep f32 operands on v5e and older."""
    try:
        kind = jax.devices()[0].device_kind.lower()
    except Exception:
        return False
    return ("v6" in kind) or ("v7" in kind)


def _pick_tile_m(m, num_cores, per_col_bytes, vmem_budget_bytes):
    """M (lane) tile: 1 step on 1-TC chips; one tile per core on v7x; VMEM-guarded."""
    if num_cores > 1 and m % (num_cores * 128) == 0:
        tile = m // num_cores          # one lane-dense tile per TensorCore
    else:
        tile = m                       # single grid step (full-M block)
    # VMEM guard for larger ConvBlock instantiations (v7x: 64 MiB physical,
    # 32 MiB default scoped): halve while the double-buffered working set is
    # too big and the halved tile stays a lane-dense divisor of M.
    while tile % 256 == 0 and tile * per_col_bytes > vmem_budget_bytes:
        tile //= 2
    return tile


# ----------------------------------------------------------------------------- 
# Wrapper
# -----------------------------------------------------------------------------
def _im2col_km(x_cnhw_padded, kh, kw, stride, h_out, w_out):
    """(C_in, N, H_pad, W_pad) -> (KH*KW*C_in, N*H_out*W_out).

    K ordering is (kh outer, kw, c_in inner), matching the weight flatten below.
    """
    c_in, n, _, _ = x_cnhw_padded.shape
    taps = []
    for i in range(kh):
        for j in range(kw):
            win = lax.slice(
                x_cnhw_padded,
                start_indices=(0, 0, i, j),
                limit_indices=(c_in, n,
                               i + (h_out - 1) * stride + 1,
                               j + (w_out - 1) * stride + 1),
                strides=(1, 1, stride, stride),
            )                                      # (C_in, N, H_out, W_out)
            taps.append(win)
    return jnp.concatenate(taps, axis=0).reshape(kh * kw * c_in,
                                                 n * h_out * w_out)


@functools.partial(jax.jit, static_argnames=("stride", "padding", "use_bf16"))
def conv_block_forward(x_nchw, weight_oihw, bias, *, stride, padding,
                       use_bf16=False):
    """Conv2d(stride, padding) + LeakyReLU(0.1), matching the PyTorch ConvBlock.

    x_nchw      : (N, C_in, H, W)          float32
    weight_oihw : (C_out, C_in, KH, KW)    float32
    bias        : (C_out,)                 float32
    returns     : (N, C_out, H_out, W_out) float32
    """
    n, c_in, h, w = x_nchw.shape
    c_out, _, kh, kw = weight_oihw.shape
    h_out = (h + 2 * padding - kh) // stride + 1
    w_out = (w + 2 * padding - kw) // stride + 1

    k = kh * kw * c_in
    m = n * h_out * w_out
    k_p = _round_up(k, 8)             # sublane-aligned contraction dim (36 -> 40)
    c_out_p = _round_up(c_out, 8)     # sublane-aligned output channels (8 -> 8)

    op_dtype = jnp.bfloat16 if use_bf16 else jnp.float32
    op_bytes = 2 if use_bf16 else 4
    # Double-buffered RHS column + f32 output column, per M element.
    per_col_bytes = 2 * (k_p * op_bytes + c_out_p * 4)
    tile_m = _pick_tile_m(m, _tensorcores_per_chip(), per_col_bytes,
                          vmem_budget_bytes=24 * 1024 * 1024)
    num_tiles = m // tile_m

    # ---- wrapper-side layout work (fused by XLA under jit) -------------------
    x_cnhw = jnp.transpose(x_nchw, (1, 0, 2, 3))                        # (C_in,N,H,W)
    x_pad = jnp.pad(x_cnhw, ((0, 0), (0, 0),
                             (padding, padding), (padding, padding)))
    rhs = _im2col_km(x_pad, kh, kw, stride, h_out, w_out)               # (K, M)
    rhs = jnp.pad(rhs, ((0, k_p - k), (0, 0))).astype(op_dtype)         # (K_p, M)

    # (C_out, C_in, KH, KW) -> (C_out, KH, KW, C_in) -> (C_out, K) -> pad.
    w2d = jnp.transpose(weight_oihw, (0, 2, 3, 1)).reshape(c_out, k)
    w2d = jnp.pad(w2d, ((0, c_out_p - c_out), (0, k_p - k))).astype(op_dtype)
    b2d = jnp.pad(bias, (0, c_out_p - c_out)).reshape(c_out_p, 1)
    b2d = b2d.astype(jnp.float32)

    # ---- the fused conv + bias + LeakyReLU kernel -----------------------------
    out2d = pl.pallas_call(
        _conv_block_kernel,
        out_shape=jax.ShapeDtypeStruct((c_out_p, m), jnp.float32),
        grid_spec=pltpu.PrefetchScalarGridSpec(
            num_scalar_prefetch=0,
            grid=(num_tiles,),
            in_specs=[
                pl.BlockSpec((c_out_p, k_p), lambda i: (0, 0)),    # weights (resident)
                pl.BlockSpec((k_p, tile_m), lambda i: (0, i)),     # im2col M-tile
                pl.BlockSpec((c_out_p, 1), lambda i: (0, 0)),      # bias (resident)
            ],
            out_specs=pl.BlockSpec((c_out_p, tile_m), lambda i: (0, i)),
        ),
        compiler_params=pltpu.CompilerParams(
            dimension_semantics=("parallel",)),
    )(w2d, rhs, b2d)

    # Drop channel padding; (C_out, N*H_out*W_out) -> NCHW via cheap
    # leading-axis transpose.
    out = out2d[:c_out].reshape(c_out, n, h_out, w_out)
    return jnp.transpose(out, (1, 0, 2, 3)).astype(x_nchw.dtype)


# ----------------------------------------------------------------------------- 
# Reference + harness
# -----------------------------------------------------------------------------
def _reference_forward(x_nchw, weight_oihw, bias, *, stride, padding):
    out = lax.conv_general_dilated(
        x_nchw, weight_oihw,
        window_strides=(stride, stride),
        padding=[(padding, padding), (padding, padding)],
        dimension_numbers=("NCHW", "OIHW", "NCHW"),
    )
    out = out + bias.reshape(1, -1, 1, 1)
    return jnp.where(out >= 0, out, 0.1 * out)


if __name__ == "__main__":
    # Module config: ConvBlock(in_channels=4, out_channels=8,
    #                          kernel_size=3, stride=1, padding=1)
    in_channels, out_channels = 4, 8
    kernel_size, stride, padding = 3, 1, 1
    batch, height, width = 2, 16, 16

    key = jax.random.PRNGKey(0)
    kx, kw_key, kb = jax.random.split(key, 3)

    x = jax.random.normal(kx, (batch, in_channels, height, width),
                          dtype=jnp.float32)
    # Deterministic parameter init (Kaiming-uniform-like bound, same shapes as
    # nn.Conv2d's weight/bias).
    fan_in = in_channels * kernel_size * kernel_size
    bound = 1.0 / math.sqrt(fan_in)
    weight = jax.random.uniform(
        kw_key, (out_channels, in_channels, kernel_size, kernel_size),
        minval=-bound, maxval=bound, dtype=jnp.float32)
    bias = jax.random.uniform(kb, (out_channels,),
                              minval=-bound, maxval=bound, dtype=jnp.float32)

    use_bf16 = _mxu_prefers_bf16()
    fwd = functools.partial(conv_block_forward, stride=stride,
                            padding=padding, use_bf16=use_bf16)
    out = jax.block_until_ready(fwd(x, weight, bias))

    ref = _reference_forward(x, weight, bias, stride=stride, padding=padding)
    tol = 5e-2 if use_bf16 else 1e-4
    assert out.shape == ref.shape
    err = float(jnp.max(jnp.abs(out - ref)))
    assert err < tol, f"max abs error {err} exceeds {tol}"

    print("KERNEL_OK")
</pallas_src>

<mosaic_0001>
module attributes {stable_mosaic.version = 11 : i64} {
  func.func @_conv_block_kernel(%arg0: i32, %arg1: memref<8x40xf32, #tpu.memory_space<vmem>>, %arg2: memref<40x512xf32, #tpu.memory_space<vmem>>, %arg3: memref<8x1xf32, #tpu.memory_space<vmem>>, %arg4: memref<8x512xf32, #tpu.memory_space<vmem>>) attributes {dimension_semantics = [#tpu.dimension_semantics<parallel>], iteration_bounds = array<i64: 1>, scalar_prefetch = 0 : i64, scratch_operands = 0 : i64, tpu.core_type = #tpu.core_type<tc>, window_params = [{pipeline_mode = #tpu.pipeline_mode<synchronous>, transform_indices = @transform_0, window_bounds = array<i64: 8, 40>}, {transform_indices = @transform_1, window_bounds = array<i64: 40, 512>}, {pipeline_mode = #tpu.pipeline_mode<synchronous>, transform_indices = @transform_2, window_bounds = array<i64: 8, 1>}, {transform_indices = @transform_3, window_bounds = array<i64: 8, 512>}]} {
    %c0 = arith.constant 0 : index
    %c0_0 = arith.constant 0 : index
    %0 = vector.load %arg1[%c0, %c0_0] : memref<8x40xf32, #tpu.memory_space<vmem>>, vector<8x40xf32>
    %c0_1 = arith.constant 0 : index
    %c0_2 = arith.constant 0 : index
    %1 = vector.load %arg2[%c0_1, %c0_2] : memref<40x512xf32, #tpu.memory_space<vmem>>, vector<40x512xf32>
    %cst = arith.constant dense<0.000000e+00> : vector<8x512xf32>
    %2 = tpu.matmul %0, %1, %cst {dimension_numbers = #tpu.dot_dimension_numbers<[1], [0], [0], [1], [0, 0, 1, 1], [], []>} : vector<8x40xf32>, vector<40x512xf32>, vector<8x512xf32> -> vector<8x512xf32>
    %c0_3 = arith.constant 0 : index
    %c0_4 = arith.constant 0 : index
    %3 = vector.load %arg3[%c0_3, %c0_4] : memref<8x1xf32, #tpu.memory_space<vmem>>, vector<8x1xf32>
    %4 = vector.broadcast %3 : vector<8x1xf32> to vector<8x512xf32>
    %5 = arith.addf %2, %4 : vector<8x512xf32>
    %cst_5 = arith.constant 1.000000e-01 : f32
    %6 = vector.broadcast %cst_5 : f32 to vector<8x512xf32>
    %7 = arith.mulf %6, %5 : vector<8x512xf32>
    %8 = arith.maximumf %5, %7 : vector<8x512xf32>
    %c0_6 = arith.constant 0 : index
    %c0_7 = arith.constant 0 : index
    %9 = vector.load %arg4[%c0_6, %c0_7] : memref<8x512xf32, #tpu.memory_space<vmem>>, vector<8x512xf32>
    tpu.vector_store %arg4[%c0_6, %c0_7], %8 {strides = array<i32>} : memref<8x512xf32, #tpu.memory_space<vmem>>, vector<8x512xf32>,
    return
  }
  func.func @transform_0(%arg0: i32) -> (i32, i32) {
    %c0_i32 = arith.constant 0 : i32
    %c0_i32_0 = arith.constant 0 : i32
    %c0_i32_1 = arith.constant 0 : i32
    return %c0_i32, %c0_i32_0 : i32, i32
  }
  func.func @transform_1(%arg0: i32) -> (i32, i32) {
    %c0_i32 = arith.constant 0 : i32
    %c0_i32_0 = arith.constant 0 : i32
    return %c0_i32, %arg0 : i32, i32
  }
  func.func @transform_2(%arg0: i32) -> (i32, i32) {
    %c0_i32 = arith.constant 0 : i32
    %c0_i32_0 = arith.constant 0 : i32
    %c0_i32_1 = arith.constant 0 : i32
    return %c0_i32, %c0_i32_0 : i32, i32
  }
  func.func @transform_3(%arg0: i32) -> (i32, i32) {
    %c0_i32 = arith.constant 0 : i32
    %c0_i32_0 = arith.constant 0 : i32
    return %c0_i32, %arg0 : i32, i32
  }
}

</mosaic_0001>

<bundles_post_ra>
// kernel: conv_block_forward.1
= control target key start
LH: loop header
LB: loop body
LE: loop exit
PB: predicated region body
PF: predicated region fallthrough
CT: control target
= control target key end

     0   :  { %v147_v3 = vmov 0   ;;  %vm41_vm0 = vcmask 326656   ;;  %s246_s1 = inlined_call_operand.vmem [shape: f32[40,512], index: 1, kind: input, shape index: {}]   ;;  %s247_s0 = inlined_call_operand.vmem [shape: f32[8,40], index: 0, kind: input, shape index: {}]   ;;  %s248_s2 = inlined_call_operand.vmem [shape: f32[8,1], index: 2, kind: input, shape index: {}]   ;;  %s249_s3 = inlined_call_operand.vmem [shape: f32[8,512], index: 3, kind: output, shape index: {}]  }
   0x1   :  { %v33_v0 = vld [vmem:[%s246_s1 + $0x90] sm:$0xff]  ;;  %v34_v1 = vld [vmem:[%s246_s1 + $0x98] sm:$0xff]  ;;  %146 = vset.pattern.permute.xlu0 %v147_v3  ;;  %v31_v5 = vld [vmem:[%s246_s1 + $0x80] sm:$0xff] }
   0x2   :  { %v29_v2 = vld [vmem:[%s246_s1 + $0x70] sm:$0xff]  ;;  %96 = vmatpush.msra.mxu2 %v33_v0  ;;  %116 = vmatpush.msra.mxu3 %v34_v1  ;;  %v30_v4 = vld [vmem:[%s246_s1 + $0x78] sm:$0xff]  ;;  %v32_v6 = vld [vmem:[%s246_s1 + $0x88] sm:$0xff] }
   0x3   :  { %56 = vmatpush.msra.mxu0 %v31_v5  ;;  %76 = vmatpush.msra.mxu1 %v32_v6  ;;  %v25_v7 = vld [vmem:[%s246_s1 + $0x50] sm:$0xff]  ;;  %v26_v8 = vld [vmem:[%s246_s1 + $0x58] sm:$0xff]  ;;  %v27_v9 = vld [vmem:[%s246_s1 + $0x60] sm:$0xff] }
   0x4   :  { %97 = vmatpush.msra.mxu2 %v29_v2  ;;  %117 = vmatpush.msra.mxu3 %v30_v4  ;;  %v28_v10 = vld [vmem:[%s246_s1 + $0x68] sm:$0xff]  ;;  %v21_v11 = vld [vmem:[%s246_s1 + $0x30] sm:$0xff]  ;;  %v22_v12 = vld [vmem:[%s246_s1 + $0x38] sm:$0xff] }
   0x5   :  { %57 = vmatpush.msra.mxu0 %v27_v9  ;;  %77 = vmatpush.msra.mxu1 %v28_v10  ;;  %v23_v13 = vld [vmem:[%s246_s1 + $0x40] sm:$0xff]  ;;  %v24_v14 = vld [vmem:[%s246_s1 + $0x48] sm:$0xff]  ;;  %v17_v16 = vld [vmem:[%s246_s1 + $0x10] sm:$0xff] }
   0x6   :  { %98 = vmatpush.msra.mxu2 %v25_v7  ;;  %118 = vmatpush.msra.mxu3 %v26_v8  ;;  %v19_v15 = vld [vmem:[%s246_s1 + $0x20] sm:$0xff]  ;;  %v18_v17 = vld [vmem:[%s246_s1 + $0x18] sm:$0xff]  ;;  %v20_v18 = vld [vmem:[%s246_s1 + $0x28] sm:$0xff] }
   0x7   :  { %58 = vmatpush.msra.mxu0 %v23_v13  ;;  %78 = vmatpush.msra.mxu1 %v24_v14  ;;  %v14_v19 = vld [vmem:[%s247_s0] sm:$0xff]  ;;  %v16_v21 = vld [vmem:[%s246_s1 + $0x8] sm:$0xff] }
   0x8   :  { %99 = vmatpush.msra.mxu2 %v21_v11  ;;  %119 = vmatpush.msra.mxu3 %v22_v12  ;;  %v15_v20 = vld [vmem:[%s246_s1] sm:$0xff] }
   0x9   :  { %59 = vmatpush.msra.mxu0 %v19_v15  ;;  %79 = vmatpush.msra.mxu1 %v20_v18  ;;  %v35_v22 = vld [vmem:[%s248_s2] sm:$0xff] }
   0xa   :  { %100 = vmatpush.msra.mxu2 %v17_v16  ;;  %120 = vmatpush.msra.mxu3 %v18_v17 }
   0xb   :  { %143 = vmatmul.msk.f32.vlgmr.msra.gmra.mxu2 %vm41_vm0, %v14_v19  ;;  %144 = vmatmul.msk.f32.vlgmr.msra.gmra.mxu3 %vm41_vm0, %v14_v19 }
   0xc   :  { %60 = vmatpush.msra.mxu0 %v15_v20  ;;  %80 = vmatpush.msra.mxu1 %v16_v21 }
   0xd   :  { %141 = vmatmul.msk.f32.vlgmr.msra.gmra.mxu0 %vm41_vm0, %v14_v19  ;;  %142 = vmatmul.msk.f32.vlgmr.msra.gmra.mxu1 %vm41_vm0, %v14_v19 }
   0xe   :  { %38 = vperm.xlu0 %146, %v35_v22  }
  0x80   :  { %v39_v23 = vpop.permute.xlu0 %38 }
  0x8a   :  { %v62_v24 = vpop.f32.mrf.mxu0  ;;  %v82_v25 = vpop.f32.mrf.mxu1 }
  0x8b   :  { %v63_v26 = vadd.f32 %v62_v24, %v39_v23  ;;  %v83_v27 = vadd.f32 %v82_v25, %v39_v23 }
  0x8d   :  { %v125_v28 = vmul.f32 0.1, %v63_v26  ;;  %v126_v29 = vmul.f32 0.1, %v83_v27 }
  0x8e   :  { %v102_v30 = vpop.f32.mrf.mxu2  ;;  %v122_v31 = vpop.f32.mrf.mxu3 }
  0x8f   :  { %v129_v32 = vmax.f32 %v63_v26, %v125_v28  ;;  %v130_v33 = vmax.f32 %v83_v27, %v126_v29  ;;  %v103_v34 = vadd.f32 %v102_v30, %v39_v23  ;;  %v123_v35 = vadd.f32 %v122_v31, %v39_v23 }
  0x91   :  { %133 = vst [vmem:[%s249_s3] sm:$0xff] %v129_v32  ;;  %v127_v36 = vmul.f32 0.1, %v103_v34  ;;  %v128_v37 = vmul.f32 0.1, %v123_v35 }
  0x92   :  { %134 = vst [vmem:[%s249_s3 + $0x8] sm:$0xff] %v130_v33 }
  0x93   :  { %v131_v38 = vmax.f32 %v103_v34, %v127_v36  ;;  %v132_v39 = vmax.f32 %v123_v35, %v128_v37 }
  0x95   :  { %135 = vst [vmem:[%s249_s3 + $0x10] sm:$0xff] %v131_v38 }
  0x96   :  { %136 = vst [vmem:[%s249_s3 + $0x18] sm:$0xff] %v132_v39 }

</bundles_post_ra>
